<compile_context>
chip_gen: v7x
topology: tpu7x:2x2x1
jax: 0.10.0
libtpu: 0.0.40
codegen_flags: <defaults>
</compile_context>

<pallas_src>
import math

import jax
import jax.numpy as jnp
from jax.experimental import pallas as pl
from jax.experimental.pallas import tpu as pltpu


def _round_up(v: int, m: int) -> int:
    return (v + m - 1) // m * m


# Explicit scoped-VMEM limit: comfortably above the ~10-12 MiB double-buffered footprint of
# the default tiles, above v5e's 16 MiB scoped default, and safely under v7x's 64 MiB physical.
_VMEM_LIMIT_BYTES = 32 * 1024 * 1024


# ---------------------------------------------------------------------------
# Kernel 1: one-shot weight pre-pass — ternary quantise + transpose.
#   in : scale (1,1) f32 SMEM, W tile (tn, tk) in its native float dtype (torch [N, K])
#   out: q^T tile (tk, tn) int8 with exact values in {-1, 0, +1}
# ---------------------------------------------------------------------------
def _quantize_transpose_kernel(scale_ref, w_ref, qt_ref):
    a = scale_ref[0, 0]                                # global scale (f32)
    half = a * 0.5
    w = w_ref[...].astype(jnp.float32)                 # in-register upcast (W may be bf16)
    q = jnp.where(w > half, 1.0, 0.0)
    q = jnp.where(w < -half, -1.0, q)
    # Transpose in f32 (widely-supported XLU path; this pass runs once), narrow to int8
    # for storage — lossless for ternary values.
    qt_ref[...] = q.T.astype(qt_ref.dtype)


def _quantize_transpose(w_pad, scale_2d, tn, tk):
    Np, Kp = w_pad.shape
    return pl.pallas_call(
        _quantize_transpose_kernel,
        out_shape=jax.ShapeDtypeStruct((Kp, Np), jnp.int8),
        grid=(Np // tn, Kp // tk),
        in_specs=[
            pl.BlockSpec(memory_space=pltpu.MemorySpace.SMEM),     # scale (1,1)
            pl.BlockSpec((tn, tk), lambda j, k: (j, k)),           # W tile (native dtype)
        ],
        out_specs=pl.BlockSpec((tk, tn), lambda j, k: (k, j)),     # transposed int8 tile
        compiler_params=pltpu.CompilerParams(
            dimension_semantics=("parallel", "parallel"),
            vmem_limit_bytes=_VMEM_LIMIT_BYTES),
    )(scale_2d, w_pad)


def prepare_bitlinear_weight(weight, *, tn=1024, tk=1024):
    """One-shot weight pre-pass: global ternary scale + int8 q^T in [Kp, Np].

    Cache/reuse the returned (qt, scale) when the weights are static (inference) and pass
    them to `bitlinear_forward(..., prepared=(qt, scale))` to skip the per-call pre-pass.
    Tile sizes must match the ones used by the forward (they are clamped identically).
    """
    N, K = weight.shape
    tn = min(tn, _round_up(N, 128))
    tk = min(tk, _round_up(K, 128))
    Np, Kp = _round_up(N, tn), _round_up(K, tk)

    # Global scale over the FULL, UNPADDED weight; f32-accumulated reduction, no full
    # f32 materialisation of W.
    a = jnp.mean(jnp.abs(weight), dtype=jnp.float32) * jnp.float32(0.7)
    scale_2d = a.reshape(1, 1)

    # Zero-pad only when needed (padded rows/cols quantise exactly to q=0).
    if Np == N and Kp == K:
        w_pad = weight
    else:
        w_pad = jnp.pad(weight, ((0, Np - N), (0, Kp - K)))

    qt = _quantize_transpose(w_pad, scale_2d, tn, tk)
    return qt, scale_2d


# ---------------------------------------------------------------------------
# Kernel 2: tiled matmul with f32 accumulator and scale/bias epilogue.
#   y_tile = a * (x_tile @ q^T_tile) + bias_tile
# ---------------------------------------------------------------------------
def _bitlinear_matmul_kernel(scale_ref, x_ref, qt_ref, b_ref, o_ref, acc_ref):
    k = pl.program_id(2)

    # x tiles arrive as bf16 (cast once in the wrapper); int8 ternary weights are upcast to
    # bf16 in-register (exact), so the MXU sees bf16 x bf16 -> f32 on every TPU generation.
    prod = jnp.dot(
        x_ref[...],
        qt_ref[...].astype(jnp.bfloat16),
        preferred_element_type=jnp.float32,
    )

    @pl.when(k == 0)
    def _():
        acc_ref[...] = prod            # direct write: no zero-init + read-modify-write pass

    @pl.when(k != 0)
    def _():
        acc_ref[...] += prod

    @pl.when(k == pl.num_programs(2) - 1)
    def _():
        a = scale_ref[0, 0]
        o_ref[...] = (acc_ref[...] * a + b_ref[...]).astype(o_ref.dtype)


# ---------------------------------------------------------------------------
# Wrapper
# ---------------------------------------------------------------------------
def bitlinear_forward(x, weight, bias=None, *, tm=512, tn=1024, tk=1024, prepared=None):
    """BitLinear forward.

    x: [..., K], weight: [N, K] (torch layout), bias: [N] or None.
    prepared: optional (qt_int8[Kp,Np], scale_2d) from `prepare_bitlinear_weight` with the
              same tn/tk, to skip the per-call weight pre-pass when weights are static.
    """
    orig_shape = x.shape
    K = orig_shape[-1]
    N, Kw = weight.shape
    assert Kw == K, f"weight shape {weight.shape} incompatible with x[..., {K}]"

    x2d = x.reshape(-1, K)
    M = x2d.shape[0]
    out_dtype = x.dtype

    # Tile sizes: lane-dense (tn, tk multiples of 128), tm multiple of 16 (bf16 tiling).
    tm = min(tm, _round_up(M, 16))
    tn = min(tn, _round_up(N, 128))
    tk = min(tk, _round_up(K, 128))
    Mp, Kp, Np = _round_up(M, tm), _round_up(K, tk), _round_up(N, tn)

    # Weight pre-pass (or reuse a cached one).
    if prepared is None:
        qt, scale_2d = prepare_bitlinear_weight(weight, tn=tn, tk=tk)
    else:
        qt, scale_2d = prepared
        assert qt.shape == (Kp, Np), (
            f"prepared qt shape {qt.shape} does not match padded ({Kp}, {Np}); "
            "prepare with the same tn/tk")

    # Activations: cast to bf16 ONCE here (halves x HBM bytes in the matmul) and pad only
    # when the shape is not already tile-aligned.  Padded K columns multiply q rows that
    # are exactly 0, padded M rows are sliced off below.
    x_bf = x2d.astype(jnp.bfloat16)
    if Mp == M and Kp == K:
        x_pad = x_bf
    else:
        x_pad = jnp.pad(x_bf, ((0, Mp - M), (0, Kp - K)))

    if bias is None:
        b_pad = jnp.zeros((1, Np), jnp.float32)
    else:
        b32 = bias.astype(jnp.float32)
        b_pad = (b32 if Np == N else jnp.pad(b32, (0, Np - N))).reshape(1, Np)

    grid = (Mp // tm, Np // tn, Kp // tk)
    out = pl.pallas_call(
        _bitlinear_matmul_kernel,
        out_shape=jax.ShapeDtypeStruct((Mp, Np), out_dtype),
        grid_spec=pltpu.PrefetchScalarGridSpec(
            num_scalar_prefetch=0,
            grid=grid,
            in_specs=[
                pl.BlockSpec(memory_space=pltpu.MemorySpace.SMEM),   # scale (1,1) f32
                pl.BlockSpec((tm, tk), lambda i, j, k: (i, k)),      # x tile (bf16)
                pl.BlockSpec((tk, tn), lambda i, j, k: (k, j)),      # q^T tile (int8)
                pl.BlockSpec((1, tn), lambda i, j, k: (0, j)),       # bias tile (f32)
            ],
            out_specs=pl.BlockSpec((tm, tn), lambda i, j, k: (i, j)),
            scratch_shapes=[pltpu.VMEM((tm, tn), jnp.float32)],      # f32 accumulator
        ),
        compiler_params=pltpu.CompilerParams(
            dimension_semantics=("parallel", "parallel", "arbitrary"),
            vmem_limit_bytes=_VMEM_LIMIT_BYTES),
    )(scale_2d, x_pad, qt, b_pad)

    return out[:M, :N].reshape(*orig_shape[:-1], N)


# ---------------------------------------------------------------------------
# References (pure JAX, matching the PyTorch forward)
# ---------------------------------------------------------------------------
def _reference_forward(x2d, weight, bias):
    """Exact f32 reference of the PyTorch module."""
    a = jnp.mean(jnp.abs(weight)) * 0.7
    q = jnp.where(weight > a / 2, 1.0, jnp.where(weight < -a / 2, -1.0, 0.0))
    w_hat = q * a
    y = jnp.dot(x2d, w_hat.T, precision=jax.lax.Precision.HIGHEST)
    return y + bias


def _reference_forward_bf16_act(x2d, weight, bias):
    """Same math but with the activation rounded to bf16 (what the MXU path computes)."""
    a = jnp.mean(jnp.abs(weight)) * 0.7
    q = jnp.where(weight > a / 2, 1.0, jnp.where(weight < -a / 2, -1.0, 0.0))
    xb = x2d.astype(jnp.bfloat16).astype(jnp.float32)
    y = jnp.dot(xb, q.T, precision=jax.lax.Precision.HIGHEST) * a
    return y + bias


if __name__ == "__main__":
    # Small shapes consistent with the module: batch=2, seq=8, in=32, out=64.
    batch, seq, in_features, out_features = 2, 8, 32, 64

    key = jax.random.PRNGKey(0)
    kx, kw, kb = jax.random.split(key, 3)

    # Deterministic init mirroring nn.Linear / kaiming_uniform_(a=sqrt(5)):
    # weight and bias both U(-1/sqrt(fan_in), 1/sqrt(fan_in)).
    bound = 1.0 / math.sqrt(in_features)
    weight = jax.random.uniform(
        kw, (out_features, in_features), jnp.float32, minval=-bound, maxval=bound
    )
    bias = jax.random.uniform(
        kb, (out_features,), jnp.float32, minval=-bound, maxval=bound
    )
    x = jax.random.normal(kx, (batch, seq, in_features), jnp.float32)

    # Path 1: per-call weight pre-pass.
    y = jax.jit(bitlinear_forward)(x, weight, bias)
    y = jax.block_until_ready(y)
    assert y.shape == (batch, seq, out_features)

    # Path 2: cached/prepared ternary weights (static-weight inference path).
    prep = prepare_bitlinear_weight(weight)
    y_prep = jax.jit(bitlinear_forward)(x, weight, bias, prepared=prep)
    y_prep = jax.block_until_ready(y_prep)
    assert jnp.allclose(y, y_prep, atol=1e-6, rtol=1e-6), "prepared-path mismatch"

    x2d = x.reshape(-1, in_features)
    # Tight check against the bf16-activation reference (kernel's exact math).
    y_bf16_ref = _reference_forward_bf16_act(x2d, weight, bias).reshape(y.shape)
    assert jnp.allclose(y, y_bf16_ref, atol=1e-4, rtol=1e-4), "bf16-path mismatch"
    # Semantic check against the pure-f32 PyTorch reference (bf16 activation rounding).
    y_ref = _reference_forward(x2d, weight, bias).reshape(y.shape)
    assert jnp.allclose(y, y_ref, atol=1e-2, rtol=1e-2), "f32 reference mismatch"

    print("KERNEL_OK")
</pallas_src>

<mosaic_0001>
module attributes {stable_mosaic.version = 11 : i64} {
  func.func @_quantize_transpose_kernel(%arg0: i32, %arg1: i32, %arg2: memref<1x1xf32, #tpu.memory_space<smem>>, %arg3: memref<128x128xf32, #tpu.memory_space<vmem>>, %arg4: memref<128x128xi8, #tpu.memory_space<vmem>>) attributes {dimension_semantics = [#tpu.dimension_semantics<parallel>, #tpu.dimension_semantics<parallel>], iteration_bounds = array<i64: 1, 1>, scalar_prefetch = 0 : i64, scratch_operands = 0 : i64, tpu.core_type = #tpu.core_type<tc>, window_params = [{transform_indices = @transform_0, window_bounds = array<i64: 1, 1>}, {transform_indices = @transform_1, window_bounds = array<i64: 128, 128>}, {transform_indices = @transform_2, window_bounds = array<i64: 128, 128>}]} {
    %c0 = arith.constant 0 : index
    %c0_0 = arith.constant 0 : index
    %0 = memref.load %arg2[%c0, %c0_0] : memref<1x1xf32, #tpu.memory_space<smem>>
    %cst = arith.constant 5.000000e-01 : f32
    %1 = arith.mulf %0, %cst : f32
    %c0_1 = arith.constant 0 : index
    %c0_2 = arith.constant 0 : index
    %2 = vector.load %arg3[%c0_1, %c0_2] : memref<128x128xf32, #tpu.memory_space<vmem>>, vector<128x128xf32>
    %3 = vector.broadcast %1 : f32 to vector<128x128xf32>
    %4 = arith.cmpf ogt, %2, %3 : vector<128x128xf32>
    %cst_3 = arith.constant 1.000000e+00 : f32
    %cst_4 = arith.constant 0.000000e+00 : f32
    %5 = vector.broadcast %cst_3 : f32 to vector<128x128xf32>
    %6 = vector.broadcast %cst_4 : f32 to vector<128x128xf32>
    %7 = arith.select %4, %5, %6 : vector<128x128xi1>, vector<128x128xf32>
    %cst_5 = arith.constant 0.000000e+00 : f32
    %8 = arith.subf %cst_5, %1 : f32
    %9 = vector.broadcast %8 : f32 to vector<128x128xf32>
    %10 = arith.cmpf olt, %2, %9 : vector<128x128xf32>
    %cst_6 = arith.constant -1.000000e+00 : f32
    %11 = vector.broadcast %cst_6 : f32 to vector<128x128xf32>
    %12 = arith.select %10, %11, %7 : vector<128x128xi1>, vector<128x128xf32>
    %13 = tpu.transpose %12, [1, 0] : vector<128x128xf32> -> vector<128x128xf32>
    %14 = arith.fptosi %13 : vector<128x128xf32> to vector<128x128xi8>
    %c0_7 = arith.constant 0 : index
    %c0_8 = arith.constant 0 : index
    %15 = vector.load %arg4[%c0_7, %c0_8] : memref<128x128xi8, #tpu.memory_space<vmem>>, vector<128x128xi8>
    tpu.vector_store %arg4[%c0_7, %c0_8], %14 {strides = array<i32>} : memref<128x128xi8, #tpu.memory_space<vmem>>, vector<128x128xi8>,
    return
  }
  func.func @transform_0(%arg0: i32, %arg1: i32) -> (i32, i32) {
    %c0_i32 = arith.constant 0 : i32
    %c0_i32_0 = arith.constant 0 : i32
    %c0_i32_1 = arith.constant 0 : i32
    return %c0_i32, %c0_i32_0 : i32, i32
  }
  func.func @transform_1(%arg0: i32, %arg1: i32) -> (i32, i32) {
    %c0_i32 = arith.constant 0 : i32
    return %arg0, %arg1 : i32, i32
  }
  func.func @transform_2(%arg0: i32, %arg1: i32) -> (i32, i32) {
    %c0_i32 = arith.constant 0 : i32
    return %arg1, %arg0 : i32, i32
  }
}

module attributes {stable_mosaic.version = 11 : i64} {
  func.func @_bitlinear_matmul_kernel(%arg0: i32, %arg1: i32, %arg2: i32, %arg3: memref<1x1xf32, #tpu.memory_space<smem>>, %arg4: memref<16x128xbf16, #tpu.memory_space<vmem>>, %arg5: memref<128x128xi8, #tpu.memory_space<vmem>>, %arg6: memref<1x128xf32, #tpu.memory_space<vmem>>, %arg7: memref<16x128xf32, #tpu.memory_space<vmem>>, %arg8: memref<16x128xf32, #tpu.memory_space<vmem>>) attributes {dimension_semantics = [#tpu.dimension_semantics<parallel>, #tpu.dimension_semantics<parallel>, #tpu.dimension_semantics<arbitrary>], iteration_bounds = array<i64: 1, 1, 1>, scalar_prefetch = 0 : i64, scratch_operands = 1 : i64, tpu.core_type = #tpu.core_type<tc>, window_params = [{transform_indices = @transform_0, window_bounds = array<i64: 1, 1>}, {transform_indices = @transform_1, window_bounds = array<i64: 16, 128>}, {transform_indices = @transform_2, window_bounds = array<i64: 128, 128>}, {transform_indices = @transform_3, window_bounds = array<i64: 1, 128>}, {transform_indices = @transform_4, window_bounds = array<i64: 16, 128>}]} {
    %c0 = arith.constant 0 : index
    %c0_0 = arith.constant 0 : index
    %0 = vector.load %arg4[%c0, %c0_0] : memref<16x128xbf16, #tpu.memory_space<vmem>>, vector<16x128xbf16>
    %c0_1 = arith.constant 0 : index
    %c0_2 = arith.constant 0 : index
    %1 = vector.load %arg5[%c0_1, %c0_2] : memref<128x128xi8, #tpu.memory_space<vmem>>, vector<128x128xi8>
    %2 = arith.sitofp %1 : vector<128x128xi8> to vector<128x128xbf16>
    %cst = arith.constant dense<0.000000e+00> : vector<16x128xf32>
    %3 = tpu.matmul %0, %2, %cst {dimension_numbers = #tpu.dot_dimension_numbers<[1], [0], [0], [1], [0, 0, 1, 1], [], []>} : vector<16x128xbf16>, vector<128x128xbf16>, vector<16x128xf32> -> vector<16x128xf32>
    %c0_i32 = arith.constant 0 : i32
    %4 = arith.cmpi eq, %arg2, %c0_i32 : i32
    %5 = arith.extui %4 : i1 to i32
    %c0_i32_3 = arith.constant 0 : i32
    %6 = arith.cmpi ne, %5, %c0_i32_3 : i32
    scf.if %6 {
      %c0_8 = arith.constant 0 : index
      %c0_9 = arith.constant 0 : index
      %13 = vector.load %arg8[%c0_8, %c0_9] : memref<16x128xf32, #tpu.memory_space<vmem>>, vector<16x128xf32>
      tpu.vector_store %arg8[%c0_8, %c0_9], %3 {strides = array<i32>} : memref<16x128xf32, #tpu.memory_space<vmem>>, vector<16x128xf32>,
    } else {
    }
    %c0_i32_4 = arith.constant 0 : i32
    %7 = arith.cmpi ne, %arg2, %c0_i32_4 : i32
    %8 = arith.extui %7 : i1 to i32
    %c0_i32_5 = arith.constant 0 : i32
    %9 = arith.cmpi ne, %8, %c0_i32_5 : i32
    scf.if %9 {
      %c0_8 = arith.constant 0 : index
      %c0_9 = arith.constant 0 : index
      %13 = vector.load %arg8[%c0_8, %c0_9] : memref<16x128xf32, #tpu.memory_space<vmem>>, vector<16x128xf32>
      %14 = arith.addf %13, %3 : vector<16x128xf32>
      %c0_10 = arith.constant 0 : index
      %c0_11 = arith.constant 0 : index
      %15 = vector.load %arg8[%c0_10, %c0_11] : memref<16x128xf32, #tpu.memory_space<vmem>>, vector<16x128xf32>
      tpu.vector_store %arg8[%c0_10, %c0_11], %14 {strides = array<i32>} : memref<16x128xf32, #tpu.memory_space<vmem>>, vector<16x128xf32>,
    } else {
    }
    %c0_i32_6 = arith.constant 0 : i32
    %10 = arith.cmpi eq, %arg2, %c0_i32_6 : i32
    %11 = arith.extui %10 : i1 to i32
    %c0_i32_7 = arith.constant 0 : i32
    %12 = arith.cmpi ne, %11, %c0_i32_7 : i32
    scf.if %12 {
      %c0_8 = arith.constant 0 : index
      %c0_9 = arith.constant 0 : index
      %13 = memref.load %arg3[%c0_8, %c0_9] : memref<1x1xf32, #tpu.memory_space<smem>>
      %c0_10 = arith.constant 0 : index
      %c0_11 = arith.constant 0 : index
      %14 = vector.load %arg8[%c0_10, %c0_11] : memref<16x128xf32, #tpu.memory_space<vmem>>, vector<16x128xf32>
      %15 = vector.broadcast %13 : f32 to vector<16x128xf32>
      %16 = arith.mulf %14, %15 : vector<16x128xf32>
      %c0_12 = arith.constant 0 : index
      %c0_13 = arith.constant 0 : index
      %17 = vector.load %arg6[%c0_12, %c0_13] : memref<1x128xf32, #tpu.memory_space<vmem>>, vector<1x128xf32>
      %18 = vector.broadcast %17 : vector<1x128xf32> to vector<16x128xf32>
      %19 = arith.addf %16, %18 : vector<16x128xf32>
      %c0_14 = arith.constant 0 : index
      %c0_15 = arith.constant 0 : index
      %20 = vector.load %arg7[%c0_14, %c0_15] : memref<16x128xf32, #tpu.memory_space<vmem>>, vector<16x128xf32>
      tpu.vector_store %arg7[%c0_14, %c0_15], %19 {strides = array<i32>} : memref<16x128xf32, #tpu.memory_space<vmem>>, vector<16x128xf32>,
    } else {
    }
    return
  }
  func.func @transform_0(%arg0: i32, %arg1: i32, %arg2: i32) -> (i32, i32) {
    %c0_i32 = arith.constant 0 : i32
    %c0_i32_0 = arith.constant 0 : i32
    %c0_i32_1 = arith.constant 0 : i32
    return %c0_i32, %c0_i32_0 : i32, i32
  }
  func.func @transform_1(%arg0: i32, %arg1: i32, %arg2: i32) -> (i32, i32) {
    %c0_i32 = arith.constant 0 : i32
    return %arg0, %arg2 : i32, i32
  }
  func.func @transform_2(%arg0: i32, %arg1: i32, %arg2: i32) -> (i32, i32) {
    %c0_i32 = arith.constant 0 : i32
    return %arg2, %arg1 : i32, i32
  }
  func.func @transform_3(%arg0: i32, %arg1: i32, %arg2: i32) -> (i32, i32) {
    %c0_i32 = arith.constant 0 : i32
    %c0_i32_0 = arith.constant 0 : i32
    return %c0_i32, %arg1 : i32, i32
  }
  func.func @transform_4(%arg0: i32, %arg1: i32, %arg2: i32) -> (i32, i32) {
    %c0_i32 = arith.constant 0 : i32
    return %arg0, %arg1 : i32, i32
  }
}

</mosaic_0001>

<bundles_post_ra>
// kernel: bitlinear_forward.2
= control target key start
LH: loop header
LB: loop body
LE: loop exit
PB: predicated region body
PF: predicated region fallthrough
CT: control target
= control target key end

     0   :  { %v194_v4 = vmov 0.0   ;;  %s325_s0 = inlined_call_operand.<no memory space> [shape: f32[1,1], index: 0, kind: input, shape index: {}]   ;;  %s326_s1 = inlined_call_operand.vmem [shape: f32[128,128], index: 1, kind: input, shape index: {}]   ;;  %s327_s2 = inlined_call_operand.vmem [shape: s8[128,128], index: 2, kind: output, shape index: {}]  }
   0x1   :  { %s13_s11 = smul.f32 0.5, %s325_s0  ;;  %v14_v0 = vld [vmem:[%s326_s1] sm:$0xff]  ;;  %v15_v1 = vld [vmem:[%s326_s1 + $0x8] sm:$0xff]  ;;  %v16_v3 = vld [vmem:[%s326_s1 + $0x10] sm:$0xff] }
   0x2   :  { %v17_v9 = vld [vmem:[%s326_s1 + $0x18] sm:$0xff]  ;;  %v18_v12 = vld [vmem:[%s326_s1 + $0x20] sm:$0xff]  ;;  %v19_v15 = vld [vmem:[%s326_s1 + $0x28] sm:$0xff] }
   0x3   :  { %v219_v2 = vstv %s13_s11  ;;  %s63_s16 = ssub.f32 0.0, %s13_s11  ;;  %v20_v18 = vld [vmem:[%s326_s1 + $0x30] sm:$0xff]  ;;  %v21_v21 = vld [vmem:[%s326_s1 + $0x38] sm:$0xff]  ;;  %v22_v24 = vld [vmem:[%s326_s1 + $0x40] sm:$0xff] }
   0x4   :  { %vm31_vm0 = vcmp.gt.f32.partialorder %v14_v0, %v219_v2  ;;  %vm32_vm1 = vcmp.gt.f32.partialorder %v15_v1, %v219_v2  ;;  %vm33_vm4 = vcmp.gt.f32.partialorder %v16_v3, %v219_v2  ;;  %vm34_vm6 = vcmp.gt.f32.partialorder %v17_v9, %v219_v2  ;;  %v23_v27 = vld [vmem:[%s326_s1 + $0x48] sm:$0xff]  ;;  %v24_v30 = vld [vmem:[%s326_s1 + $0x50] sm:$0xff]  ;;  %v25_v33 = vld [vmem:[%s326_s1 + $0x58] sm:$0xff] }
   0x5   :  { %v47_v5 = vsel %vm31_vm0, 1.0, %v194_v4  ;;  %v227_v6 = vstv %s63_s16  ;;  %v48_v7 = vsel %vm32_vm1, 1.0, %v194_v4  ;;  %v49_v11 = vsel %vm33_vm4, 1.0, %v194_v4  ;;  %v26_v36 = vld [vmem:[%s326_s1 + $0x60] sm:$0xff]  ;;  %v27_v39 = vld [vmem:[%s326_s1 + $0x68] sm:$0xff]  ;;  %v28_v42 = vld [vmem:[%s326_s1 + $0x70] sm:$0xff] }
   0x6   :  { %vm65_vm2 = vcmp.lt.f32.partialorder %v14_v0, %v227_v6  ;;  %vm66_vm3 = vcmp.lt.f32.partialorder %v15_v1, %v227_v6  ;;  %vm67_vm5 = vcmp.lt.f32.partialorder %v16_v3, %v227_v6  ;;  %v50_v14 = vsel %vm34_vm6, 1.0, %v194_v4  ;;  %v29_v45 = vld [vmem:[%s326_s1 + $0x78] sm:$0xff] }
   0x7   :  { %v81_v8 = vsel %vm65_vm2, -1.0, %v47_v5  ;;  %v82_v10 = vsel %vm66_vm3, -1.0, %v48_v7  ;;  %v83_v13 = vsel %vm67_vm5, -1.0, %v49_v11  ;;  %vm68_vm7 = vcmp.lt.f32.partialorder %v17_v9, %v227_v6 }
   0x8   :  { %97 = vxpose.xlu0.b32.start [1/16] %v81_v8, 128  ;;  %vm35_vm8 = vcmp.gt.f32.partialorder %v18_v12, %v219_v2  ;;  %v84_v16 = vsel %vm68_vm7, -1.0, %v50_v14  ;;  %vm69_vm9 = vcmp.lt.f32.partialorder %v18_v12, %v227_v6  ;;  %vm36_vm10 = vcmp.gt.f32.partialorder %v19_v15, %v219_v2 }
   0x9   :  { %v51_v17 = vsel %vm35_vm8, 1.0, %v194_v4  ;;  %v52_v20 = vsel %vm36_vm10, 1.0, %v194_v4  ;;  %vm70_vm11 = vcmp.lt.f32.partialorder %v19_v15, %v227_v6  ;;  %vm37_vm12 = vcmp.gt.f32.partialorder %v20_v18, %v219_v2 }
   0xa   :  { %v85_v19 = vsel %vm69_vm9, -1.0, %v51_v17  ;;  %v86_v22 = vsel %vm70_vm11, -1.0, %v52_v20  ;;  %v53_v23 = vsel %vm37_vm12, 1.0, %v194_v4  ;;  %vm71_vm13 = vcmp.lt.f32.partialorder %v20_v18, %v227_v6 }
   0xb   :  { %vm38_vm14 = vcmp.gt.f32.partialorder %v21_v21, %v219_v2  ;;  %v87_v25 = vsel %vm71_vm13, -1.0, %v53_v23  ;;  %vm72_vm15 = vcmp.lt.f32.partialorder %v21_v21, %v227_v6  ;;  %vm39_vm0 = vcmp.gt.f32.partialorder %v22_v24, %v219_v2 }
   0xc   :  { %98 = vxpose.xlu0.b32.cont [2/16] %v82_v10, 128  ;;  %v54_v26 = vsel %vm38_vm14, 1.0, %v194_v4  ;;  %v55_v29 = vsel %vm39_vm0, 1.0, %v194_v4  ;;  %vm73_vm1 = vcmp.lt.f32.partialorder %v22_v24, %v227_v6  ;;  %vm40_vm2 = vcmp.gt.f32.partialorder %v23_v27, %v219_v2 }
   0xd   :  { %v88_v28 = vsel %vm72_vm15, -1.0, %v54_v26  ;;  %v89_v31 = vsel %vm73_vm1, -1.0, %v55_v29  ;;  %v56_v32 = vsel %vm40_vm2, 1.0, %v194_v4  ;;  %vm74_vm3 = vcmp.lt.f32.partialorder %v23_v27, %v227_v6 }
   0xe   :  { %vm41_vm4 = vcmp.gt.f32.partialorder %v24_v30, %v219_v2  ;;  %v90_v34 = vsel %vm74_vm3, -1.0, %v56_v32  ;;  %vm75_vm5 = vcmp.lt.f32.partialorder %v24_v30, %v227_v6  ;;  %vm42_vm6 = vcmp.gt.f32.partialorder %v25_v33, %v219_v2 }
   0xf   :  { %v57_v35 = vsel %vm41_vm4, 1.0, %v194_v4  ;;  %v58_v38 = vsel %vm42_vm6, 1.0, %v194_v4  ;;  %vm76_vm7 = vcmp.lt.f32.partialorder %v25_v33, %v227_v6  ;;  %vm43_vm8 = vcmp.gt.f32.partialorder %v26_v36, %v219_v2 }
  0x10   :  { %99 = vxpose.xlu0.b32.cont [3/16] %v83_v13, 128  ;;  %v91_v37 = vsel %vm75_vm5, -1.0, %v57_v35  ;;  %v92_v40 = vsel %vm76_vm7, -1.0, %v58_v38  ;;  %v59_v41 = vsel %vm43_vm8, 1.0, %v194_v4  ;;  %vm77_vm9 = vcmp.lt.f32.partialorder %v26_v36, %v227_v6 }
  0x11   :  { %vm44_vm10 = vcmp.gt.f32.partialorder %v27_v39, %v219_v2  ;;  %v93_v43 = vsel %vm77_vm9, -1.0, %v59_v41  ;;  %vm78_vm11 = vcmp.lt.f32.partialorder %v27_v39, %v227_v6  ;;  %vm45_vm12 = vcmp.gt.f32.partialorder %v28_v42, %v219_v2 }
  0x12   :  { %v60_v44 = vsel %vm44_vm10, 1.0, %v194_v4  ;;  %v61_v47 = vsel %vm45_vm12, 1.0, %v194_v4  ;;  %vm79_vm13 = vcmp.lt.f32.partialorder %v28_v42, %v227_v6  ;;  %vm46_vm14 = vcmp.gt.f32.partialorder %v29_v45, %v219_v2 }
  0x13   :  { %v94_v46 = vsel %vm78_vm11, -1.0, %v60_v44  ;;  %v95_v48 = vsel %vm79_vm13, -1.0, %v61_v47  ;;  %v62_v49 = vsel %vm46_vm14, 1.0, %v194_v4  ;;  %vm80_vm15 = vcmp.lt.f32.partialorder %v29_v45, %v227_v6 }
  0x14   :  { %100 = vxpose.xlu0.b32.cont [4/16] %v84_v16, 128  ;;  %v96_v50 = vsel %vm80_vm15, -1.0, %v62_v49 }
  0x18   :  { %101 = vxpose.xlu0.b32.cont [5/16] %v85_v19, 128 }
  0x1c   :  { %102 = vxpose.xlu0.b32.cont [6/16] %v86_v22, 128 }
  0x20   :  { %103 = vxpose.xlu0.b32.cont [7/16] %v87_v25, 128 }
  0x24   :  { %104 = vxpose.xlu0.b32.cont [8/16] %v88_v28, 128 }
  0x28   :  { %105 = vxpose.xlu0.b32.cont [9/16] %v89_v31, 128 }
  0x2c   :  { %106 = vxpose.xlu0.b32.cont [10/16] %v90_v34, 128 }
  0x30   :  { %107 = vxpose.xlu0.b32.cont [11/16] %v91_v37, 128 }
  0x34   :  { %108 = vxpose.xlu0.b32.cont [12/16] %v92_v40, 128 }
  0x38   :  { %109 = vxpose.xlu0.b32.cont [13/16] %v93_v43, 128 }
  0x3c   :  { %110 = vxpose.xlu0.b32.cont [14/16] %v94_v46, 128 }
  0x40   :  { %111 = vxpose.xlu0.b32.cont [15/16] %v95_v48, 128 }
  0x44   :  { %112 = vxpose.xlu0.b32.end [16/16] %v96_v50, 128 }
  0x88   :  { %v113_v51 = vpop.trf.xlu0 }
  0x89   :  { %v129_v56 = vtrunc.f32 %v113_v51 }
  0x8c   :  { %v114_v52 = vpop.trf.xlu0 }
  0x8d   :  { %v130_v54 = vtrunc.f32 %v114_v52 }
  0x8f   :  { %v145_v59 = vpack.c.f32.eXmY %v129_v56, %v130_v54, 312 }
  0x90   :  { %v115_v53 = vpop.trf.xlu0 }
  0x91   :  { %v131_v57 = vtrunc.f32 %v115_v53 }
  0x94   :  { %v116_v55 = vpop.trf.xlu0 }
  0x95   :  { %v132_v58 = vtrunc.f32 %v116_v55 }
  0x97   :  { %v149_v60 = vpack.c.f32.eXmY %v131_v57, %v132_v58, 312 }
  0x98   :  { %v117_v61 = vpop.trf.xlu0 }
  0x99   :  { %v153_v62 = vpack.c.b8 %v149_v60, %v145_v59  ;;  %v133_v3 = vtrunc.f32 %v117_v61 }
  0x9b   :  { %185 = vst [vmem:[%s327_s2] sm:$0xff] %v153_v62 }
  0x9c   :  { %v118_v63 = vpop.trf.xlu0 }
  0x9d   :  { %v134_v1 = vtrunc.f32 %v118_v63 }
  0x9f   :  { %v155_v6 = vpack.c.f32.eXmY %v133_v3, %v134_v1, 312 }
  0xa0   :  { %v119_v0 = vpop.trf.xlu0 }
  0xa1   :  { %v135_v4 = vtrunc.f32 %v119_v0 }
  0xa4   :  { %v120_v2 = vpop.trf.xlu0 }
  0xa5   :  { %v136_v5 = vtrunc.f32 %v120_v2 }
  0xa7   :  { %v159_v7 = vpack.c.f32.eXmY %v135_v4, %v136_v5, 312 }
  0xa8   :  { %v121_v8 = vpop.trf.xlu0 }
  0xa9   :  { %v163_v9 = vpack.c.b8 %v159_v7, %v155_v6  ;;  %v137_v14 = vtrunc.f32 %v121_v8 }
  0xab   :  { %186 = vst [vmem:[%s327_s2 + $0x8] sm:$0xff] %v163_v9 }
  0xac   :  { %v122_v10 = vpop.trf.xlu0 }
  0xad   :  { %v138_v12 = vtrunc.f32 %v122_v10 }
  0xaf   :  { %v165_v17 = vpack.c.f32.eXmY %v137_v14, %v138_v12, 312 }
  0xb0   :  { %v123_v11 = vpop.trf.xlu0 }
  0xb1   :  { %v139_v15 = vtrunc.f32 %v123_v11 }
  0xb4   :  { %v124_v13 = vpop.trf.xlu0 }
  0xb5   :  { %v140_v16 = vtrunc.f32 %v124_v13 }
  0xb7   :  { %v169_v18 = vpack.c.f32.eXmY %v139_v15, %v140_v16, 312 }
  0xb8   :  { %v125_v19 = vpop.trf.xlu0 }
  0xb9   :  { %v173_v20 = vpack.c.b8 %v169_v18, %v165_v17  ;;  %v141_v25 = vtrunc.f32 %v125_v19 }
  0xbb   :  { %187 = vst [vmem:[%s327_s2 + $0x10] sm:$0xff] %v173_v20 }
  0xbc   :  { %v126_v21 = vpop.trf.xlu0 }
  0xbd   :  { %v142_v23 = vtrunc.f32 %v126_v21 }
  0xbf   :  { %v175_v28 = vpack.c.f32.eXmY %v141_v25, %v142_v23, 312 }
  0xc0   :  { %v127_v22 = vpop.trf.xlu0 }
  0xc1   :  { %v143_v26 = vtrunc.f32 %v127_v22 }
  0xc4   :  { %v128_v24 = vpop.trf.xlu0 }
  0xc5   :  { %v144_v27 = vtrunc.f32 %v128_v24 }
  0xc7   :  { %v179_v29 = vpack.c.f32.eXmY %v143_v26, %v144_v27, 312 }
  0xc9   :  { %v183_v30 = vpack.c.b8 %v179_v29, %v175_v28 }
  0xcb   :  { %188 = vst [vmem:[%s327_s2 + $0x18] sm:$0xff] %v183_v30 }

// kernel: bitlinear_forward.3
= control target key start
LH: loop header
LB: loop body
LE: loop exit
PB: predicated region body
PF: predicated region fallthrough
CT: control target
= control target key end

     0   :  { %v154_v0 = vmov 0.0   ;;  %vm155_vm0 = vmmov 0   ;;  %s208_s2 = inlined_call_operand.vmem [shape: s8[128,128], index: 2, kind: input, shape index: {}]   ;;  %s209_s1 = inlined_call_operand.vmem [shape: bf16[16,128], index: 1, kind: input, shape index: {}]   ;;  %s210_s0 = inlined_call_operand.<no memory space> [shape: f32[1,1], index: 0, kind: input, shape index: {}]   ;;  %s211_s3 = inlined_call_operand.vmem [shape: f32[1,128], index: 3, kind: input, shape index: {}]   ;;  %s212_s4 = inlined_call_operand.vmem [shape: f32[16,128], index: 4, kind: output, shape index: {}]  }
   0x1   :  { %131 = vmatprep.subr.bf16.mxu0 %v154_v0  ;;  %v21_v1 = vld [vmem:[%s208_s2] sm:$0xff]  ;;  %147 = vmatprep.mubr.msk.bf16.mxu0 %vm155_vm0, %v154_v0  ;;  %v22_v4 = vld [vmem:[%s208_s2 + $0x8] sm:$0xff]  ;;  %v23_v7 = vld [vmem:[%s208_s2 + $0x10] sm:$0xff]  ;;  %v102_v14 = vstv %s210_s0 }
   0x2   :  { %v25_v2 = vunpack.c.l.s8.bf16 %v21_v1  ;;  %v26_v3 = vunpack.c.h.s8.bf16 %v21_v1  ;;  %v27_v5 = vunpack.c.l.s8.bf16 %v22_v4  ;;  %v28_v6 = vunpack.c.h.s8.bf16 %v22_v4  ;;  %v24_v10 = vld [vmem:[%s208_s2 + $0x18] sm:$0xff]  ;;  %v153_v13 = vld [vmem:[%s209_s1] sm:$0xff]  }
   0x3   :  { %v29_v8 = vunpack.c.l.s8.bf16 %v23_v7  ;;  %v30_v9 = vunpack.c.h.s8.bf16 %v23_v7  ;;  %v31_v11 = vunpack.c.l.s8.bf16 %v24_v10  ;;  %v32_v12 = vunpack.c.h.s8.bf16 %v24_v10  ;;  %v121_v16 = vld [vmem:[%s211_s3] ss:$0 sm:$0xff] }
   0x4   :  { %132 = vmatpush3.bf16.msra.mxu0 %v25_v2 }
   0x5   :  { %133 = vmatprep.subr.bf16.mxu0 %v154_v0 }
   0x8   :  { %134 = vmatpush3.bf16.msra.mxu0 %v26_v3 }
   0x9   :  { %135 = vmatprep.subr.bf16.mxu0 %v154_v0 }
   0xc   :  { %136 = vmatpush3.bf16.msra.mxu0 %v27_v5 }
   0xd   :  { %137 = vmatprep.subr.bf16.mxu0 %v154_v0 }
  0x10   :  { %138 = vmatpush3.bf16.msra.mxu0 %v28_v6 }
  0x11   :  { %139 = vmatprep.subr.bf16.mxu0 %v154_v0 }
  0x14   :  { %140 = vmatpush3.bf16.msra.mxu0 %v29_v8 }
  0x15   :  { %141 = vmatprep.subr.bf16.mxu0 %v154_v0 }
  0x18   :  { %142 = vmatpush3.bf16.msra.mxu0 %v30_v9 }
  0x19   :  { %143 = vmatprep.subr.bf16.mxu0 %v154_v0 }
  0x1c   :  { %144 = vmatpush3.bf16.msra.mxu0 %v31_v11 }
  0x1d   :  { %145 = vmatprep.subr.bf16.mxu0 %v154_v0 }
  0x20   :  { %146 = vmatpush3.bf16.msra.mxu0 %v32_v12 }
  0x23   :  { %148 = vmatmul.mubr.bf16.vlgmr.msra.gmra.mrb[0].mxu0 %v153_v13 }
  0xf6   :  { %v73_v15 = vpop.f32.mrb[0].mxu0 }
  0xf7   :  { %v103_v17 = vmul.f32 %v102_v14, %v73_v15  ;;  %v149_v18 = vpop.f32.mrb[1].mxu0 }
  0xf8   :  { %v76_v19 = vpop.f32.mrb[2].mxu0 }
  0xf9   :  { %v112_v20 = vadd.f32 %v121_v16, %v103_v17  ;;  %v104_v21 = vmul.f32 %v102_v14, %v76_v19  ;;  %v150_v22 = vpop.f32.mrb[3].mxu0 }
  0xfb   :  { %114 = vst [vmem:[%s212_s4] sm:$0xff] %v112_v20  ;;  %v113_v23 = vadd.f32 %v121_v16, %v104_v21 }
  0xfd   :  { %115 = vst [vmem:[%s212_s4 + $0x8] sm:$0xff] %v113_v23 }

</bundles_post_ra>
